<compile_context>
chip_gen: v7x
topology: tpu7x:2x2x1
jax: 0.10.0
libtpu: 0.0.40
codegen_flags: <defaults>
</compile_context>

<pallas_src>
import jax
import jax.numpy as jnp
from jax.experimental import pallas as pl
from jax.experimental.pallas import tpu as pltpu

# ---------------- model hyper-params (match the PyTorch __init__) ------------
HIDDEN = 32            # hidden_size (small, consistent with the module)
NUM_CLASSES = 2
FS1 = 4                # filter_sizes1
FS2 = 65 - FS1         # filter_sizes2 = 61
NF = 16                # num_filters
SEQ = 64               # L: required so the depthwise output height == 1
T = SEQ - FS1 + 1      # 61, Conv1 output rows
MAX_BT = 128           # batch tile: M = MAX_BT*SEQ = 8192 MXU rows per step


# ------------------------------- Pallas kernel --------------------------------
def cnn_kernel(x_ref, w1_ref, b1_ref, w2_ref, b2_ref, wfc_ref, bfc_ref, out_ref):
    bt = out_ref.shape[0]
    n = bt * SEQ

    # Flatten (bt, SEQ, HIDDEN) -> (n, HIDDEN): merges leading dims, no relayout.
    x2d = x_ref[...].reshape(n, HIDDEN)

    # Build the K=128 im2col LHS with XLU sublane rolls instead of unaligned
    # slices: lane block f holds x[row + f, :].  Rows that wrap around the
    # block only reach Conv1 output rows t >= 61, and those rows are masked by
    # the zero rows of w2 below, so the wrap is harmless.
    shifted = [x2d]
    for f in range(1, FS1):
        shifted.append(pltpu.roll(x2d, n - f, axis=0))     # == roll(x2d, -f)
    x_cat = jnp.concatenate(shifted, axis=1)                # (n, FS1*HIDDEN) = (n, 128)

    # Conv1: single (n,128) @ (128,16) matmul + bias (im2col folded into K).
    s = jnp.dot(x_cat, w1_ref[...],
                preferred_element_type=jnp.float32) + b1_ref[...]      # (n, NF)

    # Cube activation.
    c = s * s * s

    # Depthwise (FS2, 1) conv == per-channel weighted sum over the T valid rows.
    # w2 is zero-padded from T=61 to SEQ=64 rows, so rows 61..63 (which may hold
    # wrapped data) contribute nothing.
    d = jnp.sum(c.reshape(bt, SEQ, NF) * w2_ref[...], axis=1) + b2_ref[...]   # (bt, NF)

    # Dropout is identity at inference.  Fully connected layer, whole tile.
    out_ref[...] = (jnp.dot(d, wfc_ref[...], preferred_element_type=jnp.float32)
                    + bfc_ref[...])                          # (bt, NUM_CLASSES)


# ------------------------- one-time weight repacking ---------------------------
def pack_params(params):
    """Repack PyTorch-layout weights for the kernel.  Call once, not per step."""
    w1, b1, w2, b2, wfc, bfc = params
    w1_k = jnp.asarray(w1, jnp.float32).reshape(NF, FS1 * HIDDEN).T   # (128, NF)
    b1_k = jnp.asarray(b1, jnp.float32).reshape(1, NF)
    w2_k = jnp.zeros((SEQ, NF), jnp.float32).at[:T, :].set(
        jnp.asarray(w2, jnp.float32)[:, 0, :, 0].T)                   # (SEQ, NF)
    b2_k = jnp.asarray(b2, jnp.float32).reshape(1, NF)
    wfc_k = jnp.asarray(wfc, jnp.float32).T                           # (NF, NC)
    bfc_k = jnp.asarray(bfc, jnp.float32).reshape(1, NUM_CLASSES)
    return w1_k, b1_k, w2_k, b2_k, wfc_k, bfc_k


# ----------------------------------- wrapper -----------------------------------
def cnn_forward(x_nchw, packed_params, block_batch=MAX_BT):
    """x_nchw: (B, 1, SEQ, HIDDEN) float32, PyTorch NCHW layout."""
    w1_k, b1_k, w2_k, b2_k, wfc_k, bfc_k = packed_params
    B = x_nchw.shape[0]
    assert x_nchw.shape[1:] == (1, SEQ, HIDDEN), (
        "CNN requires (B, 1, 64, hidden) so the depthwise output is one row")

    x = x_nchw[:, 0, :, :].astype(jnp.float32)               # (B, SEQ, HIDDEN)

    bt = min(block_batch, B)
    num_blocks = pl.cdiv(B, bt)
    b_pad = num_blocks * bt
    if b_pad != B:
        # Pad only the batch remainder with zeros (their outputs are sliced
        # away); no SEQ padding and no full-input rewrite when bt divides B.
        x = jnp.pad(x, ((0, b_pad - B), (0, 0), (0, 0)))

    out_pad = pl.pallas_call(
        cnn_kernel,
        out_shape=jax.ShapeDtypeStruct((b_pad, NUM_CLASSES), jnp.float32),
        grid=(num_blocks,),
        in_specs=[
            pl.BlockSpec((bt, SEQ, HIDDEN), lambda i: (i, 0, 0)),
            pl.BlockSpec((FS1 * HIDDEN, NF), lambda i: (0, 0)),
            pl.BlockSpec((1, NF), lambda i: (0, 0)),
            pl.BlockSpec((SEQ, NF), lambda i: (0, 0)),
            pl.BlockSpec((1, NF), lambda i: (0, 0)),
            pl.BlockSpec((NF, NUM_CLASSES), lambda i: (0, 0)),
            pl.BlockSpec((1, NUM_CLASSES), lambda i: (0, 0)),
        ],
        out_specs=pl.BlockSpec((bt, NUM_CLASSES), lambda i: (i, 0)),
        compiler_params=pltpu.CompilerParams(
            dimension_semantics=("parallel",),
            vmem_limit_bytes=48 * 1024 * 1024),
    )(x, w1_k, b1_k, w2_k, b2_k, wfc_k, bfc_k)

    return out_pad[:B]


# ------------------------------ pure-JAX reference ----------------------------
def cnn_reference(x_nchw, params):
    w1, b1, w2, b2, wfc, bfc = params
    y = jax.lax.conv_general_dilated(
        x_nchw.astype(jnp.float32), w1, (1, 1), "VALID",
        dimension_numbers=("NCHW", "OIHW", "NCHW"))
    y = y + b1.reshape(1, -1, 1, 1)
    y = y ** 3
    z = jax.lax.conv_general_dilated(
        y, w2, (1, 1), "VALID",
        dimension_numbers=("NCHW", "OIHW", "NCHW"), feature_group_count=NF)
    z = z + b2.reshape(1, -1, 1, 1)
    flat = z.reshape(z.shape[0], -1)                         # (B, NF)
    return flat @ wfc.T + bfc


# ----------------------------------- main --------------------------------------
if __name__ == "__main__":
    key = jax.random.PRNGKey(0)
    kx, k1, k2, k3, k4, k5, k6 = jax.random.split(key, 7)

    # Deterministic synthetic parameters (PyTorch-layout shapes).
    scale = 0.02
    w1 = scale * jax.random.normal(k1, (NF, 1, FS1, HIDDEN), dtype=jnp.float32)
    b1 = scale * jax.random.normal(k2, (NF,), dtype=jnp.float32)
    w2 = scale * jax.random.normal(k3, (NF, 1, FS2, 1), dtype=jnp.float32)
    b2 = scale * jax.random.normal(k4, (NF,), dtype=jnp.float32)
    wfc = scale * jax.random.normal(k5, (NUM_CLASSES, NF), dtype=jnp.float32)
    bfc = scale * jax.random.normal(k6, (NUM_CLASSES,), dtype=jnp.float32)
    params = (w1, b1, w2, b2, wfc, bfc)
    packed = pack_params(params)           # hoisted: repacked once, not per call

    # Primary small-shape check (single block).
    B = 2
    x = jax.random.normal(kx, (B, 1, SEQ, HIDDEN), dtype=jnp.float32)
    out = jax.block_until_ready(cnn_forward(x, packed))
    ref = cnn_reference(x, params)
    assert out.shape == (B, NUM_CLASSES)
    assert jnp.allclose(out, ref, rtol=1e-3, atol=1e-5), (out, ref)

    # Secondary check: multi-block grid + batch-remainder padding + roll-wrap
    # masking across batch elements (bt=8 sublane-aligned output blocks).
    B2 = 20
    x2 = jax.random.normal(kx, (B2, 1, SEQ, HIDDEN), dtype=jnp.float32)
    out2 = jax.block_until_ready(cnn_forward(x2, packed, block_batch=8))
    ref2 = cnn_reference(x2, params)
    assert out2.shape == (B2, NUM_CLASSES)
    assert jnp.allclose(out2, ref2, rtol=1e-3, atol=1e-5), (out2, ref2)

    print("KERNEL_OK")
</pallas_src>

<mosaic_0001>
module attributes {stable_mosaic.version = 11 : i64} {
  func.func @cnn_kernel(%arg0: i32, %arg1: memref<2x64x32xf32, #tpu.memory_space<vmem>>, %arg2: memref<128x16xf32, #tpu.memory_space<vmem>>, %arg3: memref<1x16xf32, #tpu.memory_space<vmem>>, %arg4: memref<64x16xf32, #tpu.memory_space<vmem>>, %arg5: memref<1x16xf32, #tpu.memory_space<vmem>>, %arg6: memref<16x2xf32, #tpu.memory_space<vmem>>, %arg7: memref<1x2xf32, #tpu.memory_space<vmem>>, %arg8: memref<2x2xf32, #tpu.memory_space<vmem>>) attributes {dimension_semantics = [#tpu.dimension_semantics<parallel>], iteration_bounds = array<i64: 1>, scalar_prefetch = 0 : i64, scratch_operands = 0 : i64, tpu.core_type = #tpu.core_type<tc>, window_params = [{transform_indices = @transform_0, window_bounds = array<i64: 2, 64, 32>}, {pipeline_mode = #tpu.pipeline_mode<synchronous>, transform_indices = @transform_1, window_bounds = array<i64: 128, 16>}, {pipeline_mode = #tpu.pipeline_mode<synchronous>, transform_indices = @transform_2, window_bounds = array<i64: 1, 16>}, {pipeline_mode = #tpu.pipeline_mode<synchronous>, transform_indices = @transform_3, window_bounds = array<i64: 64, 16>}, {pipeline_mode = #tpu.pipeline_mode<synchronous>, transform_indices = @transform_4, window_bounds = array<i64: 1, 16>}, {pipeline_mode = #tpu.pipeline_mode<synchronous>, transform_indices = @transform_5, window_bounds = array<i64: 16, 2>}, {pipeline_mode = #tpu.pipeline_mode<synchronous>, transform_indices = @transform_6, window_bounds = array<i64: 1, 2>}, {transform_indices = @transform_7, window_bounds = array<i64: 2, 2>}]} {
    %c0 = arith.constant 0 : index
    %c0_0 = arith.constant 0 : index
    %c0_1 = arith.constant 0 : index
    %0 = vector.load %arg1[%c0, %c0_0, %c0_1] : memref<2x64x32xf32, #tpu.memory_space<vmem>>, vector<2x64x32xf32>
    %1 = vector.shape_cast %0 : vector<2x64x32xf32> to vector<128x32xf32>
    %c127_i32 = arith.constant 127 : i32
    %2 = tpu.dynamic_rotate %1 by %c127_i32 dim 0 : vector<128x32xf32>, i32 -> vector<128x32xf32>
    %c126_i32 = arith.constant 126 : i32
    %3 = tpu.dynamic_rotate %1 by %c126_i32 dim 0 : vector<128x32xf32>, i32 -> vector<128x32xf32>
    %c125_i32 = arith.constant 125 : i32
    %4 = tpu.dynamic_rotate %1 by %c125_i32 dim 0 : vector<128x32xf32>, i32 -> vector<128x32xf32>
    %5 = tpu.concatenate %1, %2, %3, %4 in 1 : vector<128x32xf32>, vector<128x32xf32>, vector<128x32xf32>, vector<128x32xf32> -> vector<128x128xf32>
    %c0_2 = arith.constant 0 : index
    %c0_3 = arith.constant 0 : index
    %6 = vector.load %arg2[%c0_2, %c0_3] : memref<128x16xf32, #tpu.memory_space<vmem>>, vector<128x16xf32>
    %cst = arith.constant dense<0.000000e+00> : vector<128x16xf32>
    %7 = tpu.matmul %5, %6, %cst {dimension_numbers = #tpu.dot_dimension_numbers<[1], [0], [0], [1], [0, 0, 1, 1], [], []>} : vector<128x128xf32>, vector<128x16xf32>, vector<128x16xf32> -> vector<128x16xf32>
    %c0_4 = arith.constant 0 : index
    %c0_5 = arith.constant 0 : index
    %8 = vector.load %arg3[%c0_4, %c0_5] : memref<1x16xf32, #tpu.memory_space<vmem>>, vector<1x16xf32>
    %9 = vector.broadcast %8 : vector<1x16xf32> to vector<128x16xf32>
    %10 = arith.addf %7, %9 : vector<128x16xf32>
    %11 = arith.mulf %10, %10 : vector<128x16xf32>
    %12 = arith.mulf %11, %10 : vector<128x16xf32>
    %13 = vector.shape_cast %12 : vector<128x16xf32> to vector<2x64x16xf32>
    %c0_6 = arith.constant 0 : index
    %c0_7 = arith.constant 0 : index
    %14 = vector.load %arg4[%c0_6, %c0_7] : memref<64x16xf32, #tpu.memory_space<vmem>>, vector<64x16xf32>
    %15 = vector.shape_cast %14 : vector<64x16xf32> to vector<1x64x16xf32>
    %16 = vector.broadcast %15 : vector<1x64x16xf32> to vector<2x64x16xf32>
    %17 = arith.mulf %13, %16 : vector<2x64x16xf32>
    %cst_8 = arith.constant dense<0.000000e+00> : vector<2x16xf32>
    %18 = vector.multi_reduction <add>, %17, %cst_8 [1] : vector<2x64x16xf32> to vector<2x16xf32>
    %c0_9 = arith.constant 0 : index
    %c0_10 = arith.constant 0 : index
    %19 = vector.load %arg5[%c0_9, %c0_10] : memref<1x16xf32, #tpu.memory_space<vmem>>, vector<1x16xf32>
    %20 = vector.broadcast %19 : vector<1x16xf32> to vector<2x16xf32>
    %21 = arith.addf %18, %20 : vector<2x16xf32>
    %c0_11 = arith.constant 0 : index
    %c0_12 = arith.constant 0 : index
    %22 = vector.load %arg6[%c0_11, %c0_12] : memref<16x2xf32, #tpu.memory_space<vmem>>, vector<16x2xf32>
    %cst_13 = arith.constant dense<0.000000e+00> : vector<2x2xf32>
    %23 = tpu.matmul %21, %22, %cst_13 {dimension_numbers = #tpu.dot_dimension_numbers<[1], [0], [0], [1], [0, 0, 1, 1], [], []>} : vector<2x16xf32>, vector<16x2xf32>, vector<2x2xf32> -> vector<2x2xf32>
    %c0_14 = arith.constant 0 : index
    %c0_15 = arith.constant 0 : index
    %24 = vector.load %arg7[%c0_14, %c0_15] : memref<1x2xf32, #tpu.memory_space<vmem>>, vector<1x2xf32>
    %25 = vector.broadcast %24 : vector<1x2xf32> to vector<2x2xf32>
    %26 = arith.addf %23, %25 : vector<2x2xf32>
    %c0_16 = arith.constant 0 : index
    %c0_17 = arith.constant 0 : index
    %27 = vector.load %arg8[%c0_16, %c0_17] : memref<2x2xf32, #tpu.memory_space<vmem>>, vector<2x2xf32>
    tpu.vector_store %arg8[%c0_16, %c0_17], %26 {strides = array<i32>} : memref<2x2xf32, #tpu.memory_space<vmem>>, vector<2x2xf32>,
    return
  }
  func.func @transform_0(%arg0: i32) -> (i32, i32, i32) {
    %c0_i32 = arith.constant 0 : i32
    %c0_i32_0 = arith.constant 0 : i32
    %c0_i32_1 = arith.constant 0 : i32
    return %arg0, %c0_i32, %c0_i32_0 : i32, i32, i32
  }
  func.func @transform_1(%arg0: i32) -> (i32, i32) {
    %c0_i32 = arith.constant 0 : i32
    %c0_i32_0 = arith.constant 0 : i32
    %c0_i32_1 = arith.constant 0 : i32
    return %c0_i32, %c0_i32_0 : i32, i32
  }
  func.func @transform_2(%arg0: i32) -> (i32, i32) {
    %c0_i32 = arith.constant 0 : i32
    %c0_i32_0 = arith.constant 0 : i32
    %c0_i32_1 = arith.constant 0 : i32
    return %c0_i32, %c0_i32_0 : i32, i32
  }
  func.func @transform_3(%arg0: i32) -> (i32, i32) {
    %c0_i32 = arith.constant 0 : i32
    %c0_i32_0 = arith.constant 0 : i32
    %c0_i32_1 = arith.constant 0 : i32
    return %c0_i32, %c0_i32_0 : i32, i32
  }
  func.func @transform_4(%arg0: i32) -> (i32, i32) {
    %c0_i32 = arith.constant 0 : i32
    %c0_i32_0 = arith.constant 0 : i32
    %c0_i32_1 = arith.constant 0 : i32
    return %c0_i32, %c0_i32_0 : i32, i32
  }
  func.func @transform_5(%arg0: i32) -> (i32, i32) {
    %c0_i32 = arith.constant 0 : i32
    %c0_i32_0 = arith.constant 0 : i32
    %c0_i32_1 = arith.constant 0 : i32
    return %c0_i32, %c0_i32_0 : i32, i32
  }
  func.func @transform_6(%arg0: i32) -> (i32, i32) {
    %c0_i32 = arith.constant 0 : i32
    %c0_i32_0 = arith.constant 0 : i32
    %c0_i32_1 = arith.constant 0 : i32
    return %c0_i32, %c0_i32_0 : i32, i32
  }
  func.func @transform_7(%arg0: i32) -> (i32, i32) {
    %c0_i32 = arith.constant 0 : i32
    %c0_i32_0 = arith.constant 0 : i32
    return %arg0, %c0_i32 : i32, i32
  }
}

</mosaic_0001>

<bundles_post_ra>
// kernel: tpu_custom_call.1
= control target key start
LH: loop header
LB: loop body
LE: loop exit
PB: predicated region body
PF: predicated region fallthrough
CT: control target
= control target key end

     0   :  { %v59_v3 = vlaneseq  ;;  %s1069_s15 = smov 96   ;;  %s1070_s16 = smov 32   ;;  %s1603_s0 = inlined_call_operand.vmem [shape: f32[2,64,32], index: 0, kind: input, shape index: {}]   ;;  %s1604_s1 = inlined_call_operand.vmem [shape: f32[128,16], index: 1, kind: input, shape index: {}]   ;;  %s1605_s2 = inlined_call_operand.vmem [shape: f32[1,16], index: 2, kind: input, shape index: {}]   ;;  %s1606_s3 = inlined_call_operand.vmem [shape: f32[64,16], index: 3, kind: input, shape index: {}]   ;;  %s1607_s4 = inlined_call_operand.vmem [shape: f32[1,16], index: 4, kind: input, shape index: {}]   ;;  %s1608_s5 = inlined_call_operand.vmem [shape: f32[16,2], index: 5, kind: input, shape index: {}]   ;;  %s1609_s6 = inlined_call_operand.vmem [shape: f32[1,2], index: 6, kind: input, shape index: {}]   ;;  %s1610_s7 = inlined_call_operand.hbm [shape: f32[2,2], index: 7, kind: output, shape index: {}]  }
   0x1   :  { %v1119_v0 = vld [vmem:[%s1603_s0] sm:$0xff]  ;;  %v1124_v1 = vld [vmem:[%s1603_s0 + $0x8] sm:$0xff]  ;;  %v1129_v2 = vld [vmem:[%s1603_s0 + $0x10] sm:$0xff]  ;;  %s1071_s21 = smov 64  }
   0x2   :  { %v111_v4 = vrot.slane %v1119_v0, 3  ;;  %v112_v5 = vrot.slane %v1124_v1, 3  ;;  %v113_v6 = vrot.slane %v1129_v2, 3  ;;  %v43_v7 = vrot.slane %v1119_v0, 1  ;;  %v1138_v8 = vld [vmem:[%s1603_s0 + $0x18] sm:$0xff]  ;;  %v1143_v9 = vld [vmem:[%s1603_s0 + $0x20] sm:$0xff] }
   0x3   :  { %v1145_v10 = vshrl.u32 %v59_v3, 7  ;;  %v44_v11 = vrot.slane %v1124_v1, 1  ;;  %v45_v12 = vrot.slane %v1129_v2, 1  ;;  %v46_v13 = vrot.slane %v1138_v8, 1  ;;  %v1177_v27 = vld [vmem:[%s1603_s0 + $0x28] sm:$0xff]  ;;  %v1182_v28 = vld [vmem:[%s1603_s0 + $0x30] sm:$0xff] }
   0x4   :  { %v47_v14 = vrot.slane %v1143_v9, 1  ;;  %v78_v15 = vrot.slane %v1119_v0, 2  ;;  %v79_v16 = vrot.slane %v1124_v1, 2  ;;  %v80_v17 = vrot.slane %v1129_v2, 2  ;;  %v1205_v41 = vld [vmem:[%s1603_s0 + $0x38] sm:$0xff]  ;;  %v1210_v42 = vld [vmem:[%s1603_s0 + $0x40] sm:$0xff] }
   0x5   :  { %vm127_vm0 = vcmp.lt.s32.totalorder %v1145_v10, 5  ;;  %vm61_vm1 = vcmp.lt.s32.totalorder %v1145_v10, 7  ;;  %vm94_vm2 = vcmp.lt.s32.totalorder %v1145_v10, 6  ;;  %v114_v18 = vrot.slane %v1138_v8, 3 }
   0x6   :  { %v141_v19 = vsel %vm127_vm0, %v112_v5, %v113_v6  ;;  %v142_v20 = vsel %vm127_vm0, %v111_v4, %v112_v5  ;;  %v75_v21 = vsel %vm61_vm1, %v44_v11, %v45_v12  ;;  %v76_v22 = vsel %vm61_vm1, %v43_v7, %v44_v11 }
   0x7   :  { %v935_v23 = vpack.i.bf16 %v141_v19, %v142_v20  ;;  %v925_v24 = vpack.i.bf16 %v75_v21, %v76_v22  ;;  %v73_v25 = vsel %vm61_vm1, %v46_v13, %v47_v14  ;;  %v74_v26 = vsel %vm61_vm1, %v45_v12, %v46_v13 }
   0x8   :  { %v940_v29 = vpack.i.bf16 %v73_v25, %v74_v26  ;;  %v108_v30 = vsel %vm94_vm2, %v79_v16, %v80_v17  ;;  %v109_v31 = vsel %vm94_vm2, %v78_v15, %v79_v16  ;;  %v115_v32 = vrot.slane %v1143_v9, 3 }
   0x9   :  { %936 = vrot.lane.b32.xlu1 %v935_v23, %s1069_s15  ;;  %926 = vrot.lane.b32.xlu0 %v925_v24, %s1070_s16  ;;  %v930_v33 = vpack.i.bf16 %v108_v30, %v109_v31  ;;  %v140_v34 = vsel %vm127_vm0, %v113_v6, %v114_v18  ;;  %v81_v35 = vrot.slane %v1138_v8, 2  ;;  %v82_v36 = vrot.slane %v1143_v9, 2 }
   0xa   :  { %v139_v37 = vsel %vm127_vm0, %v114_v18, %v115_v32  ;;  %v83_v38 = vrot.slane %v1177_v27, 2  ;;  %v84_v39 = vrot.slane %v1182_v28, 2  ;;  %v48_v40 = vrot.slane %v1177_v27, 1 }
   0xb   :  { %v106_v43 = vsel %vm94_vm2, %v81_v35, %v82_v36  ;;  %v107_v44 = vsel %vm94_vm2, %v80_v17, %v81_v35  ;;  %v49_v45 = vrot.slane %v1182_v28, 1  ;;  %v950_v46 = vpack.i.bf16 %v139_v37, %v140_v34 }
   0xc   :  { %v945_v47 = vpack.i.bf16 %v106_v43, %v107_v44  ;;  %v104_v48 = vsel %vm94_vm2, %v83_v38, %v84_v39  ;;  %v105_v49 = vsel %vm94_vm2, %v82_v36, %v83_v38  ;;  %v50_v50 = vrot.slane %v1205_v41, 1 }
   0xd   :  { %941 = vrot.lane.b32.xlu1 %v940_v29, %s1070_s16  ;;  %931 = vrot.lane.b32.xlu0 %v930_v33, %s1071_s21  ;;  %v51_v51 = vrot.slane %v1210_v42, 1  ;;  %v71_v52 = vsel %vm61_vm1, %v48_v40, %v49_v45  ;;  %v72_v53 = vsel %vm61_vm1, %v47_v14, %v48_v40  ;;  %v116_v54 = vrot.slane %v1177_v27, 3 }
   0xe   :  { %v117_v55 = vrot.slane %v1182_v28, 3 }
   0xf   :  { %12 = vsyncpa [#allocation3], 0  ;;  %v960_v56 = vpack.i.bf16 %v104_v48, %v105_v49  ;;  %v118_v57 = vrot.slane %v1205_v41, 3  ;;  %v955_v58 = vpack.i.bf16 %v71_v52, %v72_v53  ;;  %v69_v59 = vsel %vm61_vm1, %v50_v50, %v51_v51  ;;  %v1248_v6 = vld [vmem:[%s1603_s0 + $0x48] sm:$0xff]  ;;  %v1253_v11 = vld [vmem:[%s1603_s0 + $0x50] sm:$0xff]  ;;  %s1075_s24 = smov [#allocation2]  }
  0x10   :  { %v70_v60 = vsel %vm61_vm1, %v49_v45, %v50_v50  ;;  %v119_v61 = vrot.slane %v1210_v42, 3  ;;  %v137_v62 = vsel %vm127_vm0, %v116_v54, %v117_v55  ;;  %v138_v63 = vsel %vm127_vm0, %v115_v32, %v116_v54  ;;  %v1272_v23 = vld [vmem:[%s1603_s0 + $0x58] sm:$0xff]  ;;  %v1277_v24 = vld [vmem:[%s1603_s0 + $0x60] sm:$0xff]  ;;  %v1321_v52 = vld [vmem:[%s1603_s0 + $0x70] sm:$0xff]  ;;  %s757_s25 = sshll.u32 %s1075_s24, 4  ;;  %s758_s25 = int_to_ptr.vmem [resolvable:$true] %s757_s25 }
  0x11   :  { %951 = vrot.lane.b32.xlu1 %v950_v46, %s1069_s15  ;;  %946 = vrot.lane.b32.xlu0 %v945_v47, %s1071_s21  ;;  %v85_v3 = vrot.slane %v1205_v41, 2  ;;  %v86_v5 = vrot.slane %v1210_v42, 2  ;;  %v970_v12 = vpack.i.bf16 %v69_v59, %v70_v60  ;;  %v136_v13 = vsel %vm127_vm0, %v117_v55, %v118_v57  ;;  %v387_v46 = vld [vmem:[%s1604_s1] sm:$0xff]  ;;  %v388_v47 = vld [vmem:[%s1604_s1 + $0x8] sm:$0xff]  ;;  %p1050_p1 = scmp.lt.s32.totalorder %s758_s25, %s758_s25 }
  0x12   :  { %v965_v14 = vpack.i.bf16 %v137_v62, %v138_v63  ;;  %v135_v16 = vsel %vm127_vm0, %v118_v57, %v119_v61  ;;  %v87_v17 = vrot.slane %v1248_v6, 2  ;;  %v88_v18 = vrot.slane %v1253_v11, 2  ;;  %v389_v53 = vld [vmem:[%s1604_s1 + $0x10] sm:$0xff]  ;;  %v390_v54 = vld [vmem:[%s1604_s1 + $0x18] sm:$0xff]  ;;  %v391_v63 = vld [vmem:[%s1604_s1 + $0x20] sm:$0xff] }
  0x13   :  { %v102_v19 = vsel %vm94_vm2, %v85_v3, %v86_v5  ;;  %v103_v20 = vsel %vm94_vm2, %v84_v39, %v85_v3  ;;  %v52_v21 = vrot.slane %v1248_v6, 1  ;;  %v53_v22 = vrot.slane %v1253_v11, 1  ;;  %v1297_v39 = vld [vmem:[%s1603_s0 + $0x68] sm:$0xff] }
  0x14   :  { %v980_v25 = vpack.i.bf16 %v135_v16, %v136_v13  ;;  %v120_v26 = vrot.slane %v1248_v6, 3  ;;  %v975_v29 = vpack.i.bf16 %v102_v19, %v103_v20  ;;  %v100_v30 = vsel %vm94_vm2, %v87_v17, %v88_v18  ;;  %v392_v3 = vld [vmem:[%s1604_s1 + $0x28] sm:$0xff]  ;;  %v1352_v16 = vld [vmem:[%s1603_s0 + $0x78] sm:$0xff] }
  0x15   :  { %961 = vrot.lane.b32.xlu1 %v960_v56, %s1071_s21  ;;  %956 = vrot.lane.b32.xlu0 %v955_v58, %s1070_s16  ;;  %v101_v31 = vsel %vm94_vm2, %v86_v5, %v87_v17  ;;  %v121_v32 = vrot.slane %v1253_v11, 3  ;;  %v67_v33 = vsel %vm61_vm1, %v52_v21, %v53_v22  ;;  %v68_v34 = vsel %vm61_vm1, %v51_v51, %v52_v21  ;;  %v400_v10 = vld [vmem:[%s1604_s1 + $0x68] sm:$0xff] }
  0x16   :  { %v54_v35 = vrot.slane %v1272_v23, 1  ;;  %v55_v36 = vrot.slane %v1277_v24, 1  ;;  %v990_v37 = vpack.i.bf16 %v100_v30, %v101_v31  ;;  %v89_v38 = vrot.slane %v1272_v23, 2 }
  0x17   :  { %v985_v40 = vpack.i.bf16 %v67_v33, %v68_v34  ;;  %v133_v43 = vsel %vm127_vm0, %v120_v26, %v121_v32  ;;  %v134_v44 = vsel %vm127_vm0, %v119_v61, %v120_v26  ;;  %v90_v45 = vrot.slane %v1277_v24, 2  ;;  %v394_v26 = vld [vmem:[%s1604_s1 + $0x38] sm:$0xff] }
  0x18   :  { %v65_v48 = vsel %vm61_vm1, %v54_v35, %v55_v36  ;;  %v66_v49 = vsel %vm61_vm1, %v53_v22, %v54_v35  ;;  %v122_v50 = vrot.slane %v1272_v23, 3  ;;  %v123_v51 = vrot.slane %v1277_v24, 3 }
  0x19   :  { %971 = vrot.lane.b32.xlu1 %v970_v12, %s1070_s16  ;;  %966 = vrot.lane.b32.xlu0 %v965_v14, %s1069_s15  ;;  %v1000_v55 = vpack.i.bf16 %v133_v43, %v134_v44  ;;  %v99_v56 = vsel %vm94_vm2, %v88_v18, %v89_v38  ;;  %v56_v57 = vrot.slane %v1297_v39, 1  ;;  %v867_v58 = vpack.c.bf16 %v388_v47, %v387_v46 }
  0x1a   :  { %v995_v59 = vpack.i.bf16 %v65_v48, %v66_v49  ;;  %v98_v60 = vsel %vm94_vm2, %v89_v38, %v90_v45  ;;  %v57_v61 = vrot.slane %v1321_v52, 1  ;;  %v871_v62 = vpack.c.bf16 %v390_v54, %v389_v53  ;;  %v395_v38 = vld [vmem:[%s1604_s1 + $0x40] sm:$0xff] }
  0x1b   :  { %v131_v5 = vsel %vm127_vm0, %v122_v50, %v123_v51  ;;  %v132_v12 = vsel %vm127_vm0, %v121_v32, %v122_v50  ;;  %v91_v13 = vrot.slane %v1297_v39, 2  ;;  %v92_v14 = vrot.slane %v1321_v52, 2  ;;  %868 = vmatprep.subr.bf16.mxu0 %v867_v58  ;;  %902 = vmatprep.subr.bf16.mxu1 %v867_v58  ;;  %v397_v50 = vld [vmem:[%s1604_s1 + $0x50] sm:$0xff] }
  0x1c   :  { %870 = vmatpush3.bf16.msra.mxu0 %v867_v58  ;;  %v1005_v17 = vpack.i.bf16 %v98_v60, %v99_v56  ;;  %v875_v18 = vpack.c.bf16 %v392_v3, %v391_v63  ;;  %910 = vmatpush3.bf16.msra.mxu1 %v867_v58  ;;  %v1010_v19 = vpack.i.bf16 %v131_v5, %v132_v12  ;;  %v124_v22 = vrot.slane %v1297_v39, 3  ;;  %v402_v60 = vld [vmem:[%s1604_s1 + $0x78] sm:$0xff] }
  0x1d   :  { %981 = vrot.lane.b32.xlu1 %v980_v25, %s1069_s15  ;;  %976 = vrot.lane.b32.xlu0 %v975_v29, %s1071_s21  ;;  %v63_v20 = vsel %vm61_vm1, %v56_v57, %v57_v61  ;;  %v64_v21 = vsel %vm61_vm1, %v55_v36, %v56_v57  ;;  %v393_v25 = vld [vmem:[%s1604_s1 + $0x30] sm:$0xff]  ;;  %v96_v29 = vsel %vm94_vm2, %v91_v13, %v92_v14  ;;  %v125_v31 = vrot.slane %v1321_v52, 3 }
  0x1e   :  { %872 = vmatprep.subr.bf16.mxu0 %v871_v62  ;;  %v97_v30 = vsel %vm94_vm2, %v90_v45, %v91_v13  ;;  %v58_v32 = vrot.slane %v1352_v16, 1  ;;  %903 = vmatprep.subr.bf16.mxu1 %v871_v62  ;;  %v879_v33 = vpack.c.bf16 %v394_v26, %v393_v25  ;;  %v1015_v34 = vpack.i.bf16 %v63_v20, %v64_v21 }
  0x1f   :  { %v1020_v35 = vpack.i.bf16 %v96_v29, %v97_v30  ;;  %v130_v36 = vsel %vm127_vm0, %v123_v51, %v124_v22  ;;  %v129_v43 = vsel %vm127_vm0, %v124_v22, %v125_v31  ;;  %v126_v46 = vrot.slane %v1352_v16, 3 }
  0x20   :  { %874 = vmatpush3.bf16.msra.mxu0 %v871_v62  ;;  %911 = vmatpush3.bf16.msra.mxu1 %v871_v62  ;;  %v62_v44 = vsel %vm61_vm1, %v57_v61, %v58_v32  ;;  %v77_v45 = vsel %vm61_vm1, %v58_v32, %v43_v7  ;;  %v1025_v48 = vpack.i.bf16 %v129_v43, %v130_v36  ;;  %v398_v7 = vld [vmem:[%s1604_s1 + $0x58] sm:$0xff]  ;;  %vm336_vm3 = vcmask 261120  }
  0x21   :  { %991 = vrot.lane.b32.xlu1 %v990_v37, %s1071_s21  ;;  %986 = vrot.lane.b32.xlu0 %v985_v40, %s1070_s16  ;;  %v93_v37 = vrot.slane %v1352_v16, 2  ;;  %v396_v40 = vld [vmem:[%s1604_s1 + $0x48] sm:$0xff]  ;;  %v1030_v49 = vpack.i.bf16 %v77_v45, %v62_v44  ;;  %v128_v54 = vsel %vm127_vm0, %v125_v31, %v126_v46  ;;  %v887_v56 = vpack.c.bf16 %v398_v7, %v397_v50 }
  0x22   :  { %876 = vmatprep.subr.bf16.mxu0 %v875_v18  ;;  %904 = vmatprep.subr.bf16.mxu1 %v875_v18  ;;  %v883_v47 = vpack.c.bf16 %v396_v40, %v395_v38  ;;  %vm353_vm4 = vcmask 523264   ;;  %vm370_vm5 = vcmask 785408   ;;  %vm1073_vm6 = vmmov 0  }
  0x23   :  { %v95_v51 = vsel %vm94_vm2, %v92_v14, %v93_v37  ;;  %v110_v53 = vsel %vm94_vm2, %v93_v37, %v78_v15  ;;  %v399_v15 = vld [vmem:[%s1604_s1 + $0x60] sm:$0xff]  ;;  %vm611_vm7 = vcmask 130048   ;;  %vm675_vm8 = vcmask 1041409  }
  0x24   :  { %878 = vmatpush3.bf16.msra.mxu0 %v875_v18  ;;  %912 = vmatpush3.bf16.msra.mxu1 %v875_v18  ;;  %v1035_v57 = vpack.i.bf16 %v110_v53, %v95_v51  ;;  %vm749_vm9 = vcmask 9216  }
  0x25   :  { %1001 = vrot.lane.b32.xlu1 %v1000_v55, %s1069_s15  ;;  %996 = vrot.lane.b32.xlu0 %v995_v59, %s1070_s16  ;;  %v143_v55 = vsel %vm127_vm0, %v126_v46, %v111_v4  ;;  %v891_v4 = vpack.c.bf16 %v400_v10, %v399_v15  ;;  %v401_v59 = vld [vmem:[%s1604_s1 + $0x70] sm:$0xff] }
  0x26   :  { %880 = vmatprep.subr.bf16.mxu0 %v879_v33  ;;  %905 = vmatprep.subr.bf16.mxu1 %v879_v33  ;;  %v1040_v58 = vpack.i.bf16 %v143_v55, %v128_v54  ;;  %v895_v61 = vpack.c.bf16 %v402_v60, %v401_v59 }
  0x28   :  { %882 = vmatpush3.bf16.msra.mxu0 %v879_v33  ;;  %913 = vmatpush3.bf16.msra.mxu1 %v879_v33 }
  0x29   :  { %1006 = vrot.lane.b32.xlu0 %v1005_v17, %s1071_s21  ;;  %1011 = vrot.lane.b32.xlu1 %v1010_v19, %s1069_s15 }
  0x2a   :  { %884 = vmatprep.subr.bf16.mxu0 %v883_v47  ;;  %906 = vmatprep.subr.bf16.mxu1 %v883_v47 }
  0x2c   :  { %886 = vmatpush3.bf16.msra.mxu0 %v883_v47  ;;  %914 = vmatpush3.bf16.msra.mxu1 %v883_v47 }
  0x2d   :  { %1016 = vrot.lane.b32.xlu0 %v1015_v34, %s1070_s16  ;;  %1021 = vrot.lane.b32.xlu1 %v1020_v35, %s1071_s21 }
  0x2e   :  { %888 = vmatprep.subr.bf16.mxu0 %v887_v56  ;;  %907 = vmatprep.subr.bf16.mxu1 %v887_v56 }
  0x30   :  { %890 = vmatpush3.bf16.msra.mxu0 %v887_v56  ;;  %915 = vmatpush3.bf16.msra.mxu1 %v887_v56 }
  0x31   :  { %1026 = vrot.lane.b32.xlu0 %v1025_v48, %s1069_s15  ;;  %1031 = vrot.lane.b32.xlu1 %v1030_v49, %s1070_s16 }
  0x32   :  { %892 = vmatprep.subr.bf16.mxu0 %v891_v4  ;;  %908 = vmatprep.subr.bf16.mxu1 %v891_v4 }
  0x34   :  { %894 = vmatpush3.bf16.msra.mxu0 %v891_v4  ;;  %916 = vmatpush3.bf16.msra.mxu1 %v891_v4 }
  0x35   :  { %1036 = vrot.lane.b32.xlu0 %v1035_v57, %s1071_s21  ;;  %1041 = vrot.lane.b32.xlu1 %v1040_v58, %s1069_s15 }
  0x36   :  { %896 = vmatprep.subr.bf16.mxu0 %v895_v61  ;;  %909 = vmatprep.subr.bf16.mxu1 %v895_v61 }
  0x38   :  { %898 = vmatpush3.bf16.msra.mxu0 %v895_v61  ;;  %917 = vmatpush3.bf16.msra.mxu1 %v895_v61 }
  0x7b   :  { %v937_v62 = vpop.permute.xlu1 %936  ;;  %v927_v63 = vpop.permute.xlu0 %926 }
  0x7c   :  { %v929_v3 = vunpack.i.h.bf16 %v927_v63  ;;  %v928_v5 = vunpack.i.l.bf16 %v927_v63  ;;  %v939_v14 = vunpack.i.h.bf16 %v937_v62  ;;  %v938_v17 = vunpack.i.l.bf16 %v937_v62 }
  0x7e   :  { %v337_v22 = vsel %vm336_vm3, %v1119_v0, %v928_v5  ;;  %v338_v25 = vsel %vm336_vm3, %v1124_v1, %v929_v3 }
  0x7f   :  { %v942_v12 = vpop.permute.xlu1 %941  ;;  %v932_v13 = vpop.permute.xlu0 %931 }
  0x80   :  { %v934_v18 = vunpack.i.h.bf16 %v932_v13  ;;  %v933_v19 = vunpack.i.l.bf16 %v932_v13  ;;  %v944_v20 = vunpack.i.h.bf16 %v942_v12  ;;  %v943_v21 = vunpack.i.l.bf16 %v942_v12 }
  0x82   :  { %v354_v26 = vsel %vm353_vm4, %v337_v22, %v933_v19  ;;  %v355_v29 = vsel %vm353_vm4, %v338_v25, %v934_v18  ;;  %v339_v0 = vsel %vm336_vm3, %v1129_v2, %v943_v21  ;;  %v340_v1 = vsel %vm336_vm3, %v1138_v8, %v944_v20 }
  0x83   :  { %v952_v30 = vpop.permute.xlu1 %951  ;;  %v947_v31 = vpop.permute.xlu0 %946  ;;  %v371_v32 = vsel %vm370_vm5, %v354_v26, %v938_v17  ;;  %v372_v33 = vsel %vm370_vm5, %v355_v29, %v939_v14 }
  0x84   :  { %v954_v34 = vunpack.i.h.bf16 %v952_v30  ;;  %v953_v35 = vunpack.i.l.bf16 %v952_v30  ;;  %v949_v36 = vunpack.i.h.bf16 %v947_v31  ;;  %v948_v37 = vunpack.i.l.bf16 %v947_v31  ;;  %836 = vmatprep.mubr.f32.mxu0 %v371_v32 }
  0x85   :  { %837 = vmatmul.mubr.f32.vlgmr.msra.gmra.mrb[0].mxu0 %v372_v33 }
  0x86   :  { %v356_v38 = vsel %vm353_vm4, %v339_v0, %v948_v37  ;;  %v357_v40 = vsel %vm353_vm4, %v340_v1, %v949_v36 }
  0x87   :  { %v962_v43 = vpop.permute.xlu1 %961  ;;  %v957_v44 = vpop.permute.xlu0 %956  ;;  %v373_v45 = vsel %vm370_vm5, %v356_v38, %v953_v35  ;;  %v374_v46 = vsel %vm370_vm5, %v357_v40, %v954_v34 }
  0x88   :  { %v959_v47 = vunpack.i.h.bf16 %v957_v44  ;;  %v958_v48 = vunpack.i.l.bf16 %v957_v44  ;;  %839 = vmatprep.mubr.f32.mxu0 %v373_v45  ;;  %v964_v49 = vunpack.i.h.bf16 %v962_v43  ;;  %v963_v50 = vunpack.i.l.bf16 %v962_v43 }
  0x89   :  { %840 = vmatmul.mubr.f32.gmra.mrb[2].mxu0 %v374_v46 }
  0x8a   :  { %v341_v2 = vsel %vm336_vm3, %v1143_v9, %v958_v48  ;;  %v342_v8 = vsel %vm336_vm3, %v1177_v27, %v959_v47 }
  0x8b   :  { %v972_v7 = vpop.permute.xlu1 %971  ;;  %v967_v51 = vpop.permute.xlu0 %966  ;;  %v358_v57 = vsel %vm353_vm4, %v341_v2, %v963_v50  ;;  %v359_v58 = vsel %vm353_vm4, %v342_v8, %v964_v49 }
  0x8c   :  { %v969_v53 = vunpack.i.h.bf16 %v967_v51  ;;  %v968_v54 = vunpack.i.l.bf16 %v967_v51  ;;  %v974_v55 = vunpack.i.h.bf16 %v972_v7  ;;  %v973_v56 = vunpack.i.l.bf16 %v972_v7 }
  0x8e   :  { %v375_v15 = vsel %vm370_vm5, %v358_v57, %v968_v54  ;;  %v376_v10 = vsel %vm370_vm5, %v359_v58, %v969_v53  ;;  %v343_v62 = vsel %vm336_vm3, %v1182_v28, %v973_v56  ;;  %v344_v63 = vsel %vm336_vm3, %v1205_v41, %v974_v55 }
  0x8f   :  { %v982_v4 = vpop.permute.xlu1 %981  ;;  %v977_v59 = vpop.permute.xlu0 %976  ;;  %842 = vmatprep.mubr.f32.mxu0 %v375_v15 }
  0x90   :  { %v984_v9 = vunpack.i.h.bf16 %v982_v4  ;;  %v983_v60 = vunpack.i.l.bf16 %v982_v4  ;;  %v979_v27 = vunpack.i.h.bf16 %v977_v59  ;;  %v978_v61 = vunpack.i.l.bf16 %v977_v59  ;;  %843 = vmatmul.mubr.f32.gmra.mrb[4].mxu0 %v376_v10 }
  0x92   :  { %v360_v3 = vsel %vm353_vm4, %v343_v62, %v978_v61  ;;  %v361_v5 = vsel %vm353_vm4, %v344_v63, %v979_v27 }
  0x93   :  { %v992_v12 = vpop.permute.xlu1 %991  ;;  %v987_v13 = vpop.permute.xlu0 %986  ;;  %v377_v14 = vsel %vm370_vm5, %v360_v3, %v983_v60  ;;  %v378_v17 = vsel %vm370_vm5, %v361_v5, %v984_v9 }
  0x94   :  { %v989_v18 = vunpack.i.h.bf16 %v987_v13  ;;  %v988_v19 = vunpack.i.l.bf16 %v987_v13  ;;  %845 = vmatprep.mubr.f32.mxu0 %v377_v14  ;;  %v994_v20 = vunpack.i.h.bf16 %v992_v12  ;;  %v993_v21 = vunpack.i.l.bf16 %v992_v12  ;;  %v663_v12 = vld [vmem:[%s1608_s5] sm:$0xff] }
  0x95   :  { %846 = vmatmul.mubr.f32.gmra.mrb[6].mxu0 %v378_v17  ;;  %v1072_v13 = vmov 0.0|0.0   ;;  %v1074_v14 = vmov 0.0   ;;  %v1502_v17 = vld [vmem:[%s1605_s2] ss:$0 sm:$0xff] }
  0x96   :  { %v345_v28 = vsel %vm336_vm3, %v1210_v42, %v988_v19  ;;  %v346_v41 = vsel %vm336_vm3, %v1248_v6, %v989_v18  ;;  %899 = vmatprep.subr.bf16.mxu1 %v1072_v13 }
  0x97   :  { %v1002_v22 = vpop.permute.xlu1 %1001  ;;  %v997_v25 = vpop.permute.xlu0 %996  ;;  %v362_v32 = vsel %vm353_vm4, %v345_v28, %v993_v21  ;;  %v363_v33 = vsel %vm353_vm4, %v346_v41, %v994_v20  ;;  %v1509_v41 = vld [vmem:[%s1606_s3 + $0x8] sm:$0xff] }
  0x98   :  { %v1004_v26 = vunpack.i.h.bf16 %v1002_v22  ;;  %v1003_v29 = vunpack.i.l.bf16 %v1002_v22  ;;  %v999_v30 = vunpack.i.h.bf16 %v997_v25  ;;  %v998_v31 = vunpack.i.l.bf16 %v997_v25 }
  0x9a   :  { %v379_v34 = vsel %vm370_vm5, %v362_v32, %v1003_v29  ;;  %v380_v35 = vsel %vm370_vm5, %v363_v33, %v1004_v26  ;;  %v347_v38 = vsel %vm336_vm3, %v1253_v11, %v998_v31  ;;  %v348_v40 = vsel %vm336_vm3, %v1272_v23, %v999_v30  ;;  %v1514_v29 = vld [vmem:[%s1606_s3] sm:$0xff] }
  0x9b   :  { %v1007_v36 = vpop.permute.xlu0 %1006  ;;  %848 = vmatprep.mubr.f32.mxu0 %v379_v34  ;;  %v1012_v42 = vpop.permute.xlu1 %1011 }
  0x9c   :  { %v1009_v37 = vunpack.i.h.bf16 %v1007_v36  ;;  %v1008_v0 = vunpack.i.l.bf16 %v1007_v36  ;;  %v1014_v6 = vunpack.i.h.bf16 %v1012_v42  ;;  %v1013_v1 = vunpack.i.l.bf16 %v1012_v42  ;;  %849 = vmatmul.mubr.f32.gmra.mrb[8].mxu0 %v380_v35 }
  0x9e   :  { %v364_v43 = vsel %vm353_vm4, %v347_v38, %v1008_v0  ;;  %v365_v44 = vsel %vm353_vm4, %v348_v40, %v1009_v37 }
  0x9f   :  { %v1017_v45 = vpop.permute.xlu0 %1016  ;;  %v1022_v46 = vpop.permute.xlu1 %1021  ;;  %v381_v47 = vsel %vm370_vm5, %v364_v43, %v1013_v1  ;;  %v382_v48 = vsel %vm370_vm5, %v365_v44, %v1014_v6  ;;  %v1524_v6 = vld [vmem:[%s1606_s3 + $0x18] sm:$0xff]  ;;  %v1529_v1 = vld [vmem:[%s1606_s3 + $0x10] sm:$0xff] }
  0xa0   :  { %v1019_v49 = vunpack.i.h.bf16 %v1017_v45  ;;  %v1018_v50 = vunpack.i.l.bf16 %v1017_v45  ;;  %851 = vmatprep.mubr.f32.mxu1 %v381_v47  ;;  %v1024_v2 = vunpack.i.h.bf16 %v1022_v46  ;;  %v1023_v8 = vunpack.i.l.bf16 %v1022_v46 }
  0xa1   :  { %852 = vmatmul.mubr.f32.vlgmr.msra.gmra.mrb[0].mxu1 %v382_v48 }
  0xa2   :  { %v349_v11 = vsel %vm336_vm3, %v1277_v24, %v1018_v50  ;;  %v350_v23 = vsel %vm336_vm3, %v1297_v39, %v1019_v49 }
  0xa3   :  { %v1027_v7 = vpop.permute.xlu0 %1026  ;;  %v1032_v51 = vpop.permute.xlu1 %1031  ;;  %v366_v57 = vsel %vm353_vm4, %v349_v11, %v1023_v8  ;;  %v367_v58 = vsel %vm353_vm4, %v350_v23, %v1024_v2 }
  0xa4   :  { %v1029_v53 = vunpack.i.h.bf16 %v1027_v7  ;;  %v1028_v54 = vunpack.i.l.bf16 %v1027_v7  ;;  %v1034_v55 = vunpack.i.h.bf16 %v1032_v51  ;;  %v1033_v56 = vunpack.i.l.bf16 %v1032_v51  ;;  %v1541_v51 = vld [vmem:[%s1606_s3 + $0x28] sm:$0xff] }
  0xa6   :  { %v383_v15 = vsel %vm370_vm5, %v366_v57, %v1028_v54  ;;  %v384_v10 = vsel %vm370_vm5, %v367_v58, %v1029_v53  ;;  %v351_v27 = vsel %vm336_vm3, %v1321_v52, %v1033_v56  ;;  %v352_v61 = vsel %vm336_vm3, %v1352_v16, %v1034_v55  ;;  %v664_v52 = vld [vmem:[%s1608_s5 + $0x8] sm:$0xff]  ;;  %v1546_v53 = vld [vmem:[%s1606_s3 + $0x20] sm:$0xff] }
  0xa7   :  { %v1037_v4 = vpop.permute.xlu0 %1036  ;;  %854 = vmatprep.mubr.f32.mxu1 %v383_v15  ;;  %v1042_v24 = vpop.permute.xlu1 %1041  ;;  %v900_v16 = vpack.c.bf16 %v664_v52, %v663_v12 }
  0xa8   :  { %v1039_v59 = vunpack.i.h.bf16 %v1037_v4  ;;  %v1038_v9 = vunpack.i.l.bf16 %v1037_v4  ;;  %v1044_v39 = vunpack.i.h.bf16 %v1042_v24  ;;  %v1043_v60 = vunpack.i.l.bf16 %v1042_v24  ;;  %855 = vmatmul.mubr.f32.gmra.mrb[2].mxu1 %v384_v10 }
  0xa9   :  { %901 = vmatpush3.bf16.msra.mxu1 %v900_v16 }
  0xaa   :  { %v368_v62 = vsel %vm353_vm4, %v351_v27, %v1038_v9  ;;  %v369_v63 = vsel %vm353_vm4, %v352_v61, %v1039_v59  ;;  %v593_v27 = vld [vmem:[%s1606_s3 + $0x30] sm:$0xff] }
  0xab   :  { %v385_v3 = vsel %vm370_vm5, %v368_v62, %v1043_v60  ;;  %v386_v5 = vsel %vm370_vm5, %v369_v63, %v1044_v39  ;;  %v594_v60 = vld [vmem:[%s1606_s3 + $0x38] sm:$0xff] }
  0xac   :  { %857 = vmatprep.mubr.f32.mxu1 %v385_v3 }
  0xad   :  { %858 = vmatmul.mubr.f32.gmra.mrb[4].mxu1 %v386_v5 }
  0xae   :  { %864 = vmatprep.mubr.msk.f32.mxu1 %vm1073_vm6, %v1074_v14 }
 0x158   :  { %v838_v18 = vpop.f32.mrb[0].mxu0 }
 0x159   :  { %v482_v19 = vadd.f32 %v838_v18, %v1502_v17  ;;  %v476_v20 = vpop.f32.mrb[1].mxu0 }
 0x15a   :  { %v477_v21 = vadd.f32 %v1502_v17, %v476_v20 }
 0x15b   :  { %v556_v28 = vmul.f32 %v482_v19, %v482_v19 }
 0x15c   :  { %v555_v22 = vmul.f32 %v477_v21, %v477_v21  ;;  %v841_v25 = vpop.f32.mrb[2].mxu0 }
 0x15d   :  { %v572_v26 = vmul.f32 %v556_v28, %v482_v19  ;;  %v492_v30 = vadd.f32 %v841_v25, %v1502_v17  ;;  %v486_v31 = vpop.f32.mrb[3].mxu0 }
 0x15e   :  { %v571_v32 = vmul.f32 %v555_v22, %v477_v21  ;;  %v487_v33 = vadd.f32 %v1502_v17, %v486_v31 }
 0x15f   :  { %v596_v34 = vmul.f32 %v1509_v41, %v572_v26  ;;  %v558_v35 = vmul.f32 %v492_v30, %v492_v30 }
 0x160   :  { %v595_v36 = vmul.f32 %v1514_v29, %v571_v32  ;;  %v557_v42 = vmul.f32 %v487_v33, %v487_v33 }
 0x161   :  { %v613_v37 = vsel %vm611_vm7, %v596_v34, 0.0  ;;  %v574_v0 = vmul.f32 %v558_v35, %v492_v30 }
 0x162   :  { %v612_v38 = vsel %vm611_vm7, %v595_v36, 0.0  ;;  %v573_v40 = vmul.f32 %v557_v42, %v487_v33 }
 0x163   :  { %v614_v43 = vadd.f32 %v613_v37, %v612_v38  ;;  %v844_v44 = vpop.f32.mrb[4].mxu0  ;;  %v598_v45 = vmul.f32 %v1524_v6, %v574_v0 }
 0x164   :  { %v597_v46 = vmul.f32 %v1529_v1, %v573_v40  ;;  %v502_v47 = vadd.f32 %v844_v44, %v1502_v17  ;;  %v496_v48 = vpop.f32.mrb[5].mxu0 }
 0x165   :  { %v497_v49 = vadd.f32 %v1502_v17, %v496_v48  ;;  %v617_v23 = vsel %vm611_vm7, %v598_v45, 0.0 }
 0x166   :  { %v615_v50 = vsel %vm611_vm7, %v597_v46, 0.0  ;;  %v560_v2 = vmul.f32 %v502_v47, %v502_v47 }
 0x167   :  { %v616_v8 = vadd.f32 %v615_v50, %v614_v43  ;;  %v559_v11 = vmul.f32 %v497_v49, %v497_v49 }
 0x168   :  { %v576_v7 = vmul.f32 %v560_v2, %v502_v47  ;;  %v847_v54 = vpop.f32.mrb[6].mxu0 }
 0x169   :  { %v575_v55 = vmul.f32 %v559_v11, %v497_v49  ;;  %v618_v56 = vadd.f32 %v617_v23, %v616_v8  ;;  %v512_v57 = vadd.f32 %v847_v54, %v1502_v17  ;;  %v506_v58 = vpop.f32.mrb[7].mxu0 }
 0x16a   :  { %v507_v15 = vadd.f32 %v1502_v17, %v506_v58  ;;  %v600_v10 = vmul.f32 %v1541_v51, %v576_v7 }
 0x16b   :  { %v599_v4 = vmul.f32 %v1546_v53, %v575_v55  ;;  %v562_v24 = vmul.f32 %v512_v57, %v512_v57 }
 0x16c   :  { %v561_v59 = vmul.f32 %v507_v15, %v507_v15  ;;  %v621_v63 = vsel %vm611_vm7, %v600_v10, 0.0 }
 0x16d   :  { %v619_v9 = vsel %vm611_vm7, %v599_v4, 0.0  ;;  %v578_v39 = vmul.f32 %v562_v24, %v512_v57 }
 0x16e   :  { %v620_v61 = vadd.f32 %v619_v9, %v618_v56  ;;  %v577_v62 = vmul.f32 %v561_v59, %v507_v15 }
 0x16f   :  { %v850_v3 = vpop.f32.mrb[8].mxu0  ;;  %v602_v5 = vmul.f32 %v594_v60, %v578_v39 }
 0x170   :  { %v601_v12 = vmul.f32 %v593_v27, %v577_v62  ;;  %v622_v52 = vadd.f32 %v621_v63, %v620_v61  ;;  %v522_v13 = vadd.f32 %v850_v3, %v1502_v17  ;;  %v516_v16 = vpop.f32.mrb[9].mxu0 }
 0x171   :  { %v517_v14 = vadd.f32 %v1502_v17, %v516_v16  ;;  %v625_v28 = vsel %vm611_vm7, %v602_v5, 0.0 }
 0x172   :  { %v623_v18 = vsel %vm611_vm7, %v601_v12, 0.0  ;;  %v564_v19 = vmul.f32 %v522_v13, %v522_v13 }
 0x173   :  { %v624_v20 = vadd.f32 %v623_v18, %v622_v52  ;;  %v563_v21 = vmul.f32 %v517_v14, %v517_v14 }
 0x174   :  { %v580_v22 = vmul.f32 %v564_v19, %v522_v13  ;;  %v853_v25 = vpop.f32.mrb[0].mxu1 }
 0x175   :  { %v626_v26 = vadd.f32 %v625_v28, %v624_v20  ;;  %v579_v30 = vmul.f32 %v563_v21, %v517_v14  ;;  %v532_v31 = vadd.f32 %v853_v25, %v1502_v17  ;;  %v526_v32 = vpop.f32.mrb[1].mxu1 }
 0x176   :  { %v604_v33 = vmul.f32 %v1509_v41, %v580_v22  ;;  %v527_v34 = vadd.f32 %v1502_v17, %v526_v32 }
 0x177   :  { %v603_v35 = vmul.f32 %v1514_v29, %v579_v30  ;;  %v566_v36 = vmul.f32 %v532_v31, %v532_v31  ;;  %v627_v10 = vrot.slane %v626_v26, 4  ;;  %v767_v30 = vld [vmem:[%s1609_s6] ss:$0 sm:$0xff] }
 0x178   :  { %v634_v42 = vsel %vm611_vm7, %v604_v33, 0.0  ;;  %v565_v37 = vmul.f32 %v527_v34, %v527_v34 }
 0x179   :  { %v633_v0 = vsel %vm611_vm7, %v603_v35, 0.0  ;;  %v582_v38 = vmul.f32 %v566_v36, %v532_v31  ;;  %v628_v3 = vadd.f32 %v627_v10, %v626_v26 }
 0x17a   :  { %v635_v40 = vadd.f32 %v634_v42, %v633_v0  ;;  %v581_v43 = vmul.f32 %v565_v37, %v527_v34 }
 0x17b   :  { %v856_v44 = vpop.f32.mrb[2].mxu1  ;;  %v606_v45 = vmul.f32 %v1524_v6, %v582_v38 }
 0x17c   :  { %v605_v46 = vmul.f32 %v1529_v1, %v581_v43  ;;  %v542_v41 = vadd.f32 %v856_v44, %v1502_v17  ;;  %v536_v47 = vpop.f32.mrb[3].mxu1 }
 0x17d   :  { %v537_v48 = vadd.f32 %v1502_v17, %v536_v47  ;;  %v638_v8 = vsel %vm611_vm7, %v606_v45, 0.0 }
 0x17e   :  { %v636_v29 = vsel %vm611_vm7, %v605_v46, 0.0  ;;  %v568_v49 = vmul.f32 %v542_v41, %v542_v41 }
 0x17f   :  { %v637_v50 = vadd.f32 %v636_v29, %v635_v40  ;;  %v567_v2 = vmul.f32 %v537_v48, %v537_v48 }
 0x180   :  { %v584_v11 = vmul.f32 %v568_v49, %v542_v41  ;;  %v859_v23 = vpop.f32.mrb[4].mxu1 }
 0x181   :  { %v583_v7 = vmul.f32 %v567_v2, %v537_v48  ;;  %v639_v54 = vadd.f32 %v638_v8, %v637_v50  ;;  %v552_v6 = vadd.f32 %v859_v23, %v1502_v17  ;;  %v546_v55 = vpop.f32.mrb[5].mxu1 }
 0x182   :  { %v547_v1 = vadd.f32 %v1502_v17, %v546_v55  ;;  %v608_v56 = vmul.f32 %v1541_v51, %v584_v11 }
 0x183   :  { %v607_v57 = vmul.f32 %v1546_v53, %v583_v7  ;;  %v570_v58 = vmul.f32 %v552_v6, %v552_v6  ;;  %v629_v53 = vrot.slane %v628_v3, 2 }
 0x184   :  { %v569_v15 = vmul.f32 %v547_v1, %v547_v1  ;;  %v642_v39 = vsel %vm611_vm7, %v608_v56, 0.0 }
 0x185   :  { %v640_v4 = vsel %vm611_vm7, %v607_v57, 0.0  ;;  %v586_v24 = vmul.f32 %v570_v58, %v552_v6  ;;  %v630_v13 = vadd.f32 %v629_v53, %v628_v3 }
 0x186   :  { %v641_v59 = vadd.f32 %v640_v4, %v639_v54  ;;  %v585_v9 = vmul.f32 %v569_v15, %v547_v1 }
 0x187   :  { %v610_v61 = vmul.f32 %v594_v60, %v586_v24  ;;  %v631_v18 = vrot.slane %v630_v13, 1  ;;  %v766_v60 = vld [vmem:[%s1607_s4] ss:$0 sm:$0xff]  ;;  %s1045_s4 = scalar_lea.vmem %s758_s25, 32 }
 0x188   :  { %v609_v62 = vmul.f32 %v593_v27, %v585_v9  ;;  %v643_v63 = vadd.f32 %v642_v39, %v641_v59  ;;  %p1046_p0 = scmp.ne.s32.totalorder %s758_s25, %s1045_s4  ;;  %p1051_p2 = scmp.lt.s32.totalorder %s1045_s4, %s1045_s4 }
 0x189   :  { %v646_v51 = vsel %vm611_vm7, %v610_v61, 0.0  ;;  %v632_v21 = vadd.f32 %v631_v18, %v630_v13 }
 0x18a   :  { %v644_v17 = vsel %vm611_vm7, %v609_v62, 0.0  ;;  %p1052_p3 = por %p1051_p2, %p1050_p1 }
 0x18b   :  { %v645_v5 = vadd.f32 %v644_v17, %v643_v63  ;;  %v661_v22 = vadd.f32 %v766_v60, %v632_v21 }
 0x18c   :  { %p1053_p4 = pnand %p1052_p3, %p1046_p0 }
 0x18d   :  { %v647_v12 = vadd.f32 %v646_v51, %v645_v5 }
 0x18f   :  { %v648_v52 = vrot.slane %v647_v12, 4 }
 0x191   :  { %v649_v16 = vadd.f32 %v648_v52, %v647_v12 }
 0x193   :  { %v650_v14 = vrot.slane %v649_v16, 2 }
 0x195   :  { %v651_v19 = vadd.f32 %v650_v14, %v649_v16 }
 0x197   :  { %v652_v20 = vrot.slane %v651_v19, 1 }
 0x199   :  { %v653_v28 = vadd.f32 %v652_v20, %v651_v19 }
 0x19b   :  { %v662_v27 = vadd.f32 %v766_v60, %v653_v28 }
 0x19d   :  { %v674_v25 = vrot.slane %v662_v27, 7 }
 0x19f   :  { %v676_v26 = vsel %vm675_vm8, %v674_v25, %v661_v22 }
 0x1a0   :  { %865 = vmatmul.mubr.msk.f32.vlgmr.msra.gmra.mrb[6].mxu1 %vm611_vm7, %v676_v26 }
 0x273   :  { %v745_v31 = vpop.f32.mrb[6].mxu1 }
 0x274   :  { %v746_v32 = vadd.f32 %v767_v30, %v745_v31  ;;  %v866_v33 = vpop.f32.mrb[7].mxu1 }
 0x276   :  { %750 = vst.msk [vmem:[#allocation2] sm:$0x3] %vm749_vm9, %v746_v32 }
 0x277   :  { %1056 = shalt.err (!%p1053_p4)
}
 0x278   :  { %s1057_s21 = scalar_lea.hbm %s1610_s7, 32 }
 0x279   :  { %p1058_p5 = scmp.ne.s32.totalorder %s1610_s7, %s1057_s21  ;;  %p1061_p6 = scmp.lt.u32.totalorder %s1057_s21, %s1610_s7 }
 0x27b   :  { %p1063_p7 = pnand %p1061_p6, %p1058_p5 }
 0x27d   :  { %1066 = shalt.err (!%p1063_p7)
}
 0x27e   :  { %760 = dma.vmem_to_hbm [thread:$0]  %s758_s25, 32, %s1610_s7, [#allocation3]  }
 0x27f   :  { %1067 = dma.done.wait [#allocation3], 32  }
 0x280   :  { %1068 = vsyncadd [#allocation3], 4294967264 }
 0x281   :  { %764 = vsyncpa [#allocation3], 1 }

</bundles_post_ra>
